<compile_context>
chip_gen: v7x
topology: tpu7x:2x2x1
jax: 0.10.0
libtpu: 0.0.40
codegen_flags: <defaults>
</compile_context>

<pallas_src>
import jax
import jax.numpy as jnp
from jax.experimental import pallas as pl
from jax.experimental.pallas import tpu as pltpu


def op_attention_kernel(x_ref, w1_ref, w2_ref, o_ref):
    """One grid step == TB batch elements.

    x_ref block : (TB, L, C)
    w1_ref      : (C, C//ratio)   (pre-transposed torch fc[0].weight)
    w2_ref      : (C//ratio, C)   (pre-transposed torch fc[2].weight)
    o_ref block : (TB, L, C)
    """
    tb, seq_len, _ = x_ref.shape

    # AdaptiveAvgPool1d(1) over the sequence axis -> per-(row, channel) mean.
    # Accumulate in f32 without materializing an f32 copy of the whole block.
    y = jnp.sum(x_ref[...], axis=1, dtype=jnp.float32) * (1.0 / seq_len)    # (TB, C)

    # Bias-free MLP gate: Linear -> ReLU -> Linear -> Sigmoid (on the MXU).
    h = jnp.maximum(
        jnp.dot(y, w1_ref[...], preferred_element_type=jnp.float32), 0.0)   # (TB, C//r)
    gate = jax.nn.sigmoid(
        jnp.dot(h, w2_ref[...], preferred_element_type=jnp.float32))        # (TB, C)

    # Channel-wise gate, broadcast over the sequence; native-dtype multiply,
    # lane-dense store (C multiple of 128 in the example).
    o_ref[...] = (x_ref[...] * gate.astype(o_ref.dtype)[:, None, :]).astype(o_ref.dtype)


def op_attention(x, w1_t, w2_t, *, target_block_bytes=1 << 20):
    """x: (B, L, C); w1_t: (C, C//ratio); w2_t: (C//ratio, C)."""
    B, L, C = x.shape

    # Pick TB so each input block is ~target_block_bytes (~1 MiB): big enough
    # to amortize the ~0.35 us per-step overhead, small enough that
    # double-buffered in + out blocks stay far under v7x's 64 MiB VMEM.
    per_batch_bytes = L * C * x.dtype.itemsize
    tb = max(1, min(B, target_block_bytes // max(per_batch_bytes, 1)))
    # Keep at least 2 grid steps when B > 1 (v7x: 2 TensorCores per chip).
    if tb >= B and B > 1:
        tb = pl.cdiv(B, 2)
    grid = (pl.cdiv(B, tb),)

    blk_spec = pl.BlockSpec((tb, L, C), lambda b: (b, 0, 0))
    return pl.pallas_call(
        op_attention_kernel,
        out_shape=jax.ShapeDtypeStruct((B, L, C), x.dtype),
        grid=grid,
        in_specs=[
            blk_spec,
            pl.BlockSpec(w1_t.shape, lambda b: (0, 0)),   # constant weight block
            pl.BlockSpec(w2_t.shape, lambda b: (0, 0)),   # constant weight block
        ],
        out_specs=blk_spec,
        compiler_params=pltpu.CompilerParams(
            dimension_semantics=("parallel",),            # shards steps on v7x; no-op v5e/v6e
            vmem_limit_bytes=32 * 1024 * 1024,            # blocks are ~MiB; fits v7x's 64 MiB
        ),
    )(x, w1_t, w2_t)


if __name__ == "__main__":
    # Small shapes consistent with the module; C is a multiple of 128 so all
    # tiles/stores are lane-dense, and C % ratio == 0.  B chosen so the grid
    # has >= 2 steps with multiple batch rows per block.
    B, L, C, ratio = 8, 16, 128, 8

    key = jax.random.PRNGKey(0)
    kx, k1, k2 = jax.random.split(key, 3)
    x = jax.random.normal(kx, (B, L, C), jnp.float32)
    # PyTorch nn.Linear weights are (out_features, in_features).
    w_fc1 = jax.random.normal(k1, (C // ratio, C), jnp.float32) * 0.1   # Linear(C, C//r)
    w_fc2 = jax.random.normal(k2, (C, C // ratio), jnp.float32) * 0.1   # Linear(C//r, C)

    # Pre-transpose to (in, out) so the kernel computes y @ W (== y @ W_torch.T).
    out = op_attention(x, w_fc1.T, w_fc2.T)
    jax.block_until_ready(out)

    # Pure-JAX reference of the PyTorch forward.
    y_ref = jnp.mean(x, axis=1)                              # (B, C) pool over L
    h_ref = jnp.maximum(y_ref @ w_fc1.T, 0.0)
    g_ref = jax.nn.sigmoid(h_ref @ w_fc2.T)
    ref = x * g_ref[:, None, :]

    assert out.shape == (B, L, C)
    assert jnp.allclose(out, ref, rtol=1e-5, atol=1e-5)
    print("KERNEL_OK")
</pallas_src>

<mosaic_0001>
module attributes {stable_mosaic.version = 11 : i64} {
  func.func @op_attention_kernel(%arg0: i32, %arg1: memref<4x16x128xf32, #tpu.memory_space<vmem>>, %arg2: memref<128x16xf32, #tpu.memory_space<vmem>>, %arg3: memref<16x128xf32, #tpu.memory_space<vmem>>, %arg4: memref<4x16x128xf32, #tpu.memory_space<vmem>>) attributes {dimension_semantics = [#tpu.dimension_semantics<parallel>], iteration_bounds = array<i64: 2>, scalar_prefetch = 0 : i64, scratch_operands = 0 : i64, tpu.core_type = #tpu.core_type<tc>, window_params = [{transform_indices = @transform_0, window_bounds = array<i64: 4, 16, 128>}, {pipeline_mode = #tpu.pipeline_mode<synchronous>, transform_indices = @transform_1, window_bounds = array<i64: 128, 16>}, {pipeline_mode = #tpu.pipeline_mode<synchronous>, transform_indices = @transform_2, window_bounds = array<i64: 16, 128>}, {transform_indices = @transform_3, window_bounds = array<i64: 4, 16, 128>}]} {
    %c0 = arith.constant 0 : index
    %c0_0 = arith.constant 0 : index
    %c0_1 = arith.constant 0 : index
    %0 = vector.load %arg1[%c0, %c0_0, %c0_1] : memref<4x16x128xf32, #tpu.memory_space<vmem>>, vector<4x16x128xf32>
    %cst = arith.constant dense<0.000000e+00> : vector<4x128xf32>
    %1 = vector.multi_reduction <add>, %0, %cst [1] : vector<4x16x128xf32> to vector<4x128xf32>
    %cst_2 = arith.constant 6.250000e-02 : f32
    %2 = vector.broadcast %cst_2 : f32 to vector<4x128xf32>
    %3 = arith.mulf %1, %2 : vector<4x128xf32>
    %c0_3 = arith.constant 0 : index
    %c0_4 = arith.constant 0 : index
    %4 = vector.load %arg2[%c0_3, %c0_4] : memref<128x16xf32, #tpu.memory_space<vmem>>, vector<128x16xf32>
    %cst_5 = arith.constant dense<0.000000e+00> : vector<4x16xf32>
    %5 = tpu.matmul %3, %4, %cst_5 {dimension_numbers = #tpu.dot_dimension_numbers<[1], [0], [0], [1], [0, 0, 1, 1], [], []>} : vector<4x128xf32>, vector<128x16xf32>, vector<4x16xf32> -> vector<4x16xf32>
    %cst_6 = arith.constant 0.000000e+00 : f32
    %6 = vector.broadcast %cst_6 : f32 to vector<4x16xf32>
    %7 = arith.maximumf %5, %6 : vector<4x16xf32>
    %c0_7 = arith.constant 0 : index
    %c0_8 = arith.constant 0 : index
    %8 = vector.load %arg3[%c0_7, %c0_8] : memref<16x128xf32, #tpu.memory_space<vmem>>, vector<16x128xf32>
    %cst_9 = arith.constant dense<0.000000e+00> : vector<4x128xf32>
    %9 = tpu.matmul %7, %8, %cst_9 {dimension_numbers = #tpu.dot_dimension_numbers<[1], [0], [0], [1], [0, 0, 1, 1], [], []>} : vector<4x16xf32>, vector<16x128xf32>, vector<4x128xf32> -> vector<4x128xf32>
    %10 = arith.negf %9 : vector<4x128xf32>
    %11 = math.exp %10 : vector<4x128xf32>
    %cst_10 = arith.constant 1.000000e+00 : f32
    %12 = vector.broadcast %cst_10 : f32 to vector<4x128xf32>
    %13 = arith.addf %12, %11 : vector<4x128xf32>
    %14 = arith.divf %12, %13 : vector<4x128xf32>
    %c0_11 = arith.constant 0 : index
    %c0_12 = arith.constant 0 : index
    %c0_13 = arith.constant 0 : index
    %15 = vector.load %arg1[%c0_11, %c0_12, %c0_13] : memref<4x16x128xf32, #tpu.memory_space<vmem>>, vector<4x16x128xf32>
    %16 = vector.shape_cast %14 : vector<4x128xf32> to vector<4x1x128xf32>
    %17 = vector.broadcast %16 : vector<4x1x128xf32> to vector<4x16x128xf32>
    %18 = arith.mulf %15, %17 : vector<4x16x128xf32>
    %c0_14 = arith.constant 0 : index
    %c0_15 = arith.constant 0 : index
    %c0_16 = arith.constant 0 : index
    %19 = vector.load %arg4[%c0_14, %c0_15, %c0_16] : memref<4x16x128xf32, #tpu.memory_space<vmem>>, vector<4x16x128xf32>
    tpu.vector_store %arg4[%c0_14, %c0_15, %c0_16], %18 {strides = array<i32>} : memref<4x16x128xf32, #tpu.memory_space<vmem>>, vector<4x16x128xf32>,
    return
  }
  func.func @transform_0(%arg0: i32) -> (i32, i32, i32) {
    %c0_i32 = arith.constant 0 : i32
    %c0_i32_0 = arith.constant 0 : i32
    %c0_i32_1 = arith.constant 0 : i32
    return %arg0, %c0_i32, %c0_i32_0 : i32, i32, i32
  }
  func.func @transform_1(%arg0: i32) -> (i32, i32) {
    %c0_i32 = arith.constant 0 : i32
    %c0_i32_0 = arith.constant 0 : i32
    %c0_i32_1 = arith.constant 0 : i32
    return %c0_i32, %c0_i32_0 : i32, i32
  }
  func.func @transform_2(%arg0: i32) -> (i32, i32) {
    %c0_i32 = arith.constant 0 : i32
    %c0_i32_0 = arith.constant 0 : i32
    %c0_i32_1 = arith.constant 0 : i32
    return %c0_i32, %c0_i32_0 : i32, i32
  }
  func.func @transform_3(%arg0: i32) -> (i32, i32, i32) {
    %c0_i32 = arith.constant 0 : i32
    %c0_i32_0 = arith.constant 0 : i32
    %c0_i32_1 = arith.constant 0 : i32
    return %arg0, %c0_i32, %c0_i32_0 : i32, i32, i32
  }
}

</mosaic_0001>

<bundles_post_ra>
// kernel: tpu_custom_call.1
= control target key start
LH: loop header
LB: loop body
LE: loop exit
PB: predicated region body
PF: predicated region fallthrough
CT: control target
= control target key end

     0   :  { %8 = vsyncpa [#allocation3], 0  ;;  %s982_s0 = inlined_call_operand.vmem [shape: f32[8,16,128], index: 0, kind: input, shape index: {}]   ;;  %s983_s1 = inlined_call_operand.vmem [shape: f32[128,16], index: 1, kind: input, shape index: {}]   ;;  %s984_s2 = inlined_call_operand.vmem [shape: f32[16,128], index: 2, kind: input, shape index: {}]   ;;  %s985_s3 = inlined_call_operand.hbm [shape: f32[8,16,128], index: 3, kind: output, shape index: {}]  }
   0x1   :  { %10 = vsyncpa [#allocation3 + $0x1], 0  ;;  %s781_s12 = smov 0   ;;  %s783_s13 = smov 0  }
   0x2   :  { %s785_s14 = smov 0   ;;  %s787_s15 = smov 0  }
   0x3 LB: > { %s802_s16 = sadd.s32 4294967295, %s752_s15   ;;  %s533_s17 = sadd.s32 4294967294, %s752_s15   ;;  %s752_s15 = sphi %s787_s15, %s991_s15   ;;  %s748_s14 = sphi %s785_s14, %s990_s14   ;;  %s744_s13 = sphi %s783_s13, %s989_s13   ;;  %s740_s12 = sphi %s781_s12, %s988_s12  }
   0x4   : > { %s806_s18 = sadd.s32 1, %s752_s15   ;;  %s91_s19 = sadd.s32 1, %s748_s14 }
   0x5   : > { %s88_s20 = ssub.s32 %s752_s15, %s806_s18  ;;  %p101_p0 = scmp.ne.s32.totalorder %s748_s14, %s744_s13 }
   0x6   : > { %p89_p1 = scmp.eq.s32.totalorder %s88_s20, 0  ;;  %p102_p2 = scmp.eq.s32.totalorder %s802_s16, 1 }
   0x7   : > { %p107_p3 = scmp.ne.s32.totalorder %s744_s13, %s740_s12  ;;  %p108_p4 = scmp.eq.s32.totalorder %s533_s17, 1 }
   0x8   : > { %s817_s21 = scalar_select %p89_p1, %s748_s14, %s91_s19  }
   0x9   : > { %p819_p5 = por %p102_p2, %p101_p0  ;;  %p823_p6 = por %p108_p4, %p107_p3 }
   0xa   : > { %p536_p7 = scmp.ge.s32.totalorder %s752_s15, 1  ;;  %p142_p8 = scmp.lt.s32.totalorder %s752_s15, 3 }
   0xc   : > { %p143_p9 = pnand %p536_p7, %p142_p8 }
   0xd   : > { %v215_v0 = vld [vmem:[%s983_s1] sm:$0xff] (!%p143_p9)  ;;  %v216_v1 = vld [vmem:[%s983_s1 + $0x8] sm:$0xff] (!%p143_p9)  ;;  %v217_v2 = vld [vmem:[%s983_s1 + $0x10] sm:$0xff] (!%p143_p9)  ;;  %v754_v3 = vmov (!%p143_p9), 0.0|0.0   ;;  %vm755_vm0 = vmmov (!%p143_p9), 0   ;;  %v756_v6 = vmov (!%p143_p9), 0.0  }
   0xe   : > { %146 = sbr.rel (%p143_p9) target bundleno = 526 (0x20e), region = 32  ;;  %614 = vmatprep.subr.bf16.mxu0 (!%p143_p9), %v754_v3  ;;  %v615_v4 = vpack.c.bf16 (!%p143_p9), %v216_v1, %v215_v0  ;;  %v218_v5 = vld [vmem:[%s983_s1 + $0x18] sm:$0xff] (!%p143_p9)  ;;  %604 = vmatprep.mubr.msk.f32.mxu0 (!%p143_p9), %vm755_vm0, %v756_v6  ;;  %s538_s5 = sshll.u32 (!%p143_p9), %s802_s16, 2  ;;  %v219_v8 = vld [vmem:[%s983_s1 + $0x20] sm:$0xff] (!%p143_p9)  ;;  %v220_v9 = vld [vmem:[%s983_s1 + $0x28] sm:$0xff] (!%p143_p9)  ;;  %vm235_vm1 = vcmask (!%p143_p9), 1041409  }
   0xf   : > { %p168_p10 = scmp.lt.s32.totalorder (!%p143_p9), %s538_s5, 7  ;;  %638 = vmatprep.subr.bf16.mxu1 (!%p143_p9), %v754_v3  ;;  %611 = vmatprep.mubr.msk.f32.mxu1 (!%p143_p9), %vm755_vm0, %v756_v6  ;;  %v618_v7 = vpack.c.bf16 (!%p143_p9), %v218_v5, %v217_v2  ;;  %v621_v10 = vpack.c.bf16 (!%p143_p9), %v220_v9, %v219_v8  ;;  %v221_v11 = vld [vmem:[%s983_s1 + $0x30] sm:$0xff] (!%p143_p9)  ;;  %v222_v12 = vld [vmem:[%s983_s1 + $0x38] sm:$0xff] (!%p143_p9)  ;;  %v223_v27 = vld [vmem:[%s983_s1 + $0x40] sm:$0xff] (!%p143_p9)  ;;  %vm237_vm2 = vcmask (!%p143_p9), 1042434   ;;  %vm239_vm3 = vcmask (!%p143_p9), 1043459  }
  0x10   : > { %616 = vmatpush3.bf16.msra.mxu0 (!%p143_p9), %v615_v4  ;;  %v624_v24 = vpack.c.bf16 (!%p143_p9), %v222_v12, %v221_v11  ;;  %v224_v28 = vld [vmem:[%s983_s1 + $0x48] sm:$0xff] (!%p143_p9)  ;;  %v225_v38 = vld [vmem:[%s983_s1 + $0x50] sm:$0xff] (!%p143_p9)  ;;  %v226_v39 = vld [vmem:[%s983_s1 + $0x58] sm:$0xff] (!%p143_p9)  ;;  %vm315_vm4 = vcmask (!%p143_p9), 130048   ;;  %s164_s29 = sand.u32 (!%p143_p9), 1, %s744_s13   ;;  %s551_s4 = sshll.u32 (!%p143_p9), %s802_s16, 10 }
  0x11   : > { %617 = vmatprep.subr.bf16.mxu0 (!%p143_p9), %v754_v3  ;;  %v627_v35 = vpack.c.bf16 (!%p143_p9), %v224_v28, %v223_v27  ;;  %v630_v46 = vpack.c.bf16 (!%p143_p9), %v226_v39, %v225_v38  ;;  %v227_v49 = vld [vmem:[%s983_s1 + $0x60] sm:$0xff] (!%p143_p9)  ;;  %v228_v50 = vld [vmem:[%s983_s1 + $0x68] sm:$0xff] (!%p143_p9)  ;;  %v229_v60 = vld [vmem:[%s983_s1 + $0x70] sm:$0xff] (!%p143_p9)  ;;  %s537_s30 = sshll.u32 (!%p143_p9), %s164_s29, 6  ;;  %s933_s16 = scalar_lea.hbm (!%p143_p9), %s985_s3, %s551_s4 }
  0x12   : > { %v633_v57 = vpack.c.bf16 (!%p143_p9), %v228_v50, %v227_v49  ;;  %v230_v61 = vld [vmem:[%s983_s1 + $0x78] sm:$0xff] (!%p143_p9)  ;;  %v313_v6 = vld [vmem:[%s984_s2] sm:$0xff] (!%p143_p9)  ;;  %s941_s9 = scalar_lea.sflag (!%p143_p9), [#allocation3], %s164_s29  ;;  %s758_s11 = smov (!%p143_p9), [#allocation2]  }
  0x13   : > { %v636_v1 = vpack.c.bf16 (!%p143_p9), %v230_v61, %v229_v60  ;;  %s694_s17 = sshll.u32 (!%p143_p9), %s758_s11, 4  ;;  %s695_s17 = int_to_ptr.vmem [resolvable:$false] %s694_s17 }
  0x14   : > { %619 = vmatpush3.bf16.msra.mxu0 (!%p143_p9), %v618_v7  ;;  %v314_v7 = vld [vmem:[%s984_s2 + $0x8] sm:$0xff] (!%p143_p9)  ;;  %s696_s19 = scalar_lea.vmem (!%p143_p9), %s695_s17, 2048 }
  0x15   : > { %s993_s5 = smov (!%p168_p10, %s538_s5), 7  ;;  %620 = vmatprep.subr.bf16.mxu0 %v754_v3  ;;  %v639_v8 = vpack.c.bf16 %v314_v7, %v313_v6 }
  0x16   : > { %s549_s10 = sshll.u32 %s993_s5, 4  ;;  %s166_s5 = scalar_lea.vmem [#allocation2], %s537_s30 }
  0x17   : > { %s172_s26 = scalar_lea.vmem %s982_s0, %s549_s10  ;;  %640 = vmatpush3.bf16.msra.mxu1 %v639_v8  ;;  %s471_s6 = sshll.u32 %s166_s5, 4  ;;  %s935_s6 = int_to_ptr.vmem [resolvable:$true] %s471_s6 }
  0x18   : > { %v861_v13 = vld [vmem:[%s172_s26] sm:$0xff]  ;;  %v863_v14 = vld [vmem:[%s172_s26 + $0x8] sm:$0xff]  ;;  %v865_v15 = vld [vmem:[%s172_s26 + $0x10] sm:$0xff]  ;;  %622 = vmatpush3.bf16.msra.mxu0 %v621_v10  ;;  %s690_s10 = scalar_lea.vmem %s935_s6, 1024  ;;  %p697_p0 = scmp.lt.s32.totalorder %s935_s6, %s695_s17 }
  0x19   : > { %v867_v16 = vld [vmem:[%s172_s26 + $0x18] sm:$0xff]  ;;  %v869_v17 = vld [vmem:[%s172_s26 + $0x20] sm:$0xff]  ;;  %v871_v18 = vld [vmem:[%s172_s26 + $0x28] sm:$0xff]  ;;  %v183_v19 = vadd.f32 %v863_v14, %v861_v13  ;;  %623 = vmatprep.subr.bf16.mxu0 %v754_v3  ;;  %p691_p11 = scmp.ne.s32.totalorder %s935_s6, %s690_s10  ;;  %p698_p1 = scmp.lt.s32.totalorder %s696_s19, %s690_s10 }
  0x1a   : > { %v875_v20 = vld [vmem:[%s172_s26 + $0x30] sm:$0xff]  ;;  %v877_v21 = vld [vmem:[%s172_s26 + $0x38] sm:$0xff]  ;;  %v190_v22 = vadd.f32 %v867_v16, %v865_v15  ;;  %v197_v23 = vadd.f32 %v871_v18, %v869_v17 }
  0x1b   : > { %v184_v25 = vrot.slane %v183_v19, 4  ;;  %v204_v26 = vadd.f32 %v877_v21, %v875_v20  ;;  %p692_p12 = pnand %p691_p11, %p819_p5  ;;  %p699_p2 = por %p698_p1, %p697_p0 }
  0x1c   : > { %v191_v29 = vrot.slane %v190_v22, 4  ;;  %v198_v30 = vrot.slane %v197_v23, 4  ;;  %625 = vmatpush3.bf16.msra.mxu0 %v624_v24  ;;  %v757_v24 = vmov 1966171168  }
  0x1d   : > { %v185_v31 = vadd.f32 %v184_v25, %v183_v19  ;;  %v205_v32 = vrot.slane %v204_v26, 4  ;;  %626 = vmatprep.subr.bf16.mxu0 %v754_v3  ;;  %v397_v25 = vunpack.c.l.s4 %v757_v24  ;;  %p693_p13 = pneg %p692_p12 }
  0x1e   : > { %v192_v33 = vadd.f32 %v191_v29, %v190_v22  ;;  %v199_v34 = vadd.f32 %v198_v30, %v197_v23 }
  0x1f   : > { %v186_v36 = vrot.slane %v185_v31, 2  ;;  %v206_v37 = vadd.f32 %v205_v32, %v204_v26  ;;  %v399_v26 = vlaneseq  ;;  %v398_v27 = vunpack.c.0.s8 %v397_v25  ;;  %p700_p3 = pnand %p699_p2, %p693_p13 }
  0x20   : > { %v193_v40 = vrot.slane %v192_v33, 2  ;;  %v200_v41 = vrot.slane %v199_v34, 2  ;;  %628 = vmatpush3.bf16.msra.mxu0 %v627_v35 }
  0x21   : > { %v187_v42 = vadd.f32 %v186_v36, %v185_v31  ;;  %v207_v43 = vrot.slane %v206_v37, 2  ;;  %629 = vmatprep.subr.bf16.mxu0 %v754_v3  ;;  %v400_v28 = vshrl.u32 %v399_v26, 7 }
  0x22   : > { %v194_v44 = vadd.f32 %v193_v40, %v192_v33  ;;  %v201_v45 = vadd.f32 %v200_v41, %v199_v34 }
  0x23   : > { %v188_v47 = vrot.slane %v187_v42, 1  ;;  %v208_v48 = vadd.f32 %v207_v43, %v206_v37  ;;  %v401_v29 = vsub.s32 %v398_v27, %v400_v28  ;;  %v422_v32 = vsub.s32 0, %v400_v28 }
  0x24   : > { %v195_v51 = vrot.slane %v194_v44, 1  ;;  %v202_v52 = vrot.slane %v201_v45, 1  ;;  %631 = vmatpush3.bf16.msra.mxu0 %v630_v46 }
  0x25   : > { %v189_v53 = vadd.f32 %v188_v47, %v187_v42  ;;  %v209_v54 = vrot.slane %v208_v48, 1  ;;  %632 = vmatprep.subr.bf16.mxu0 %v754_v3 }
  0x26   : > { %v196_v55 = vadd.f32 %v195_v51, %v194_v44  ;;  %v203_v56 = vadd.f32 %v202_v52, %v201_v45 }
  0x27   : > { %v210_v58 = vadd.f32 %v209_v54, %v208_v48  ;;  %v211_v59 = vmul.f32 0.0625, %v189_v53 }
  0x28   : > { %v212_v62 = vmul.f32 0.0625, %v196_v55  ;;  %v213_v63 = vmul.f32 0.0625, %v203_v56  ;;  %634 = vmatpush3.bf16.msra.mxu0 %v633_v57 }
  0x29   : > { %v214_v2 = vmul.f32 0.0625, %v210_v58  ;;  %635 = vmatprep.subr.bf16.mxu0 %v754_v3 }
  0x2a   : > { %v236_v0 = vsel %vm235_vm1, %v212_v62, %v211_v59 }
  0x2b   : > { %v238_v4 = vsel %vm237_vm2, %v213_v63, %v236_v0 }
  0x2c   : > { %637 = vmatpush3.bf16.msra.mxu0 %v636_v1  ;;  %v240_v5 = vsel %vm239_vm3, %v214_v2, %v238_v4 }
  0x2f   : > { %605 = vmatmul.mubr.f32.vlgmr.msra.gmra.mrb[0].mxu0 %v240_v5 }
 0x102   : > { %v308_v9 = vpop.f32.mrb[0].mxu0 }
 0x103   : > { %v312_v10 = vmax.f32 %v308_v9, 0.0  ;;  %v606_v11 = vpop.f32.mrb[1].mxu0 }
 0x105   : > { %612 = vmatmul.mubr.msk.f32.vlgmr.msra.gmra.mrb[0].mxu1 %vm315_vm4, %v312_v10 }
 0x1d8   : > { %v385_v3 = vpop.f32.mrb[0].mxu1 }
 0x1d9   : > { %v542_v12 = vmul.f32 -1.442695, %v385_v3  ;;  %v613_v19 = vpop.f32.mrb[1].mxu1 }
 0x1db   : > { %686 = vpow2.f32 %v542_v12 }
 0x1e5   : > { %v687_v22 = vpop.eup %686 }
 0x1e6   : > { %v392_v23 = vadd.f32 1.0, %v687_v22 }
 0x1e8   : > { %688 = vrcp.f32 %v392_v23 }
 0x1f2   : > { %v689_v30 = vpop.eup %688 }
 0x1f3   : > { %v402_v31 = vrot.slane %v689_v30, %v401_v29 }
 0x1f5   : > { %v403_v33 = vcombine.high %v402_v31, %v402_v31  ;;  %v410_v34 = vrot.slane %v402_v31, %v401_v29 }
 0x1f7   : > { %v417_v35 = vrot.slane %v403_v33, %v401_v29  ;;  %v418_v36 = vcombine.high %v410_v34, %v410_v34  ;;  %v423_v37 = vrot.slane %v410_v34, %v422_v32 }
 0x1f9   : > { %v419_v38 = vcombine.high %v417_v35, %v417_v35  ;;  %v427_v39 = vrot.slane %v417_v35, %v422_v32  ;;  %v431_v40 = vrot.slane %v418_v36, %v422_v32  ;;  %v440_v41 = vmul.f32 %v423_v37, %v861_v13 }
 0x1fa   : > { %v441_v42 = vmul.f32 %v423_v37, %v863_v14 }
 0x1fb   : > { %v435_v43 = vrot.slane %v419_v38, %v422_v32  ;;  %v442_v44 = vmul.f32 %v427_v39, %v865_v15  ;;  %v443_v45 = vmul.f32 %v427_v39, %v867_v16  ;;  %v444_v46 = vmul.f32 %v431_v40, %v869_v17  ;;  %448 = vst [vmem:[%s166_s5] sm:$0xff] %v440_v41 }
 0x1fc   : > { %v445_v47 = vmul.f32 %v431_v40, %v871_v18  ;;  %449 = vst [vmem:[%s166_s5 + $0x8] sm:$0xff] %v441_v42 }
 0x1fd   : > { %v446_v13 = vmul.f32 %v435_v43, %v875_v20  ;;  %v447_v14 = vmul.f32 %v435_v43, %v877_v21  ;;  %450 = vst [vmem:[%s166_s5 + $0x10] sm:$0xff] %v442_v44  ;;  %451 = vst [vmem:[%s166_s5 + $0x18] sm:$0xff] %v443_v45 }
 0x1fe   : > { %452 = vst [vmem:[%s166_s5 + $0x20] sm:$0xff] %v444_v46  ;;  %453 = vst [vmem:[%s166_s5 + $0x28] sm:$0xff] %v445_v47 }
 0x1ff   : > { %454 = vst [vmem:[%s166_s5 + $0x30] sm:$0xff] %v446_v13  ;;  %455 = vst [vmem:[%s166_s5 + $0x38] sm:$0xff] %v447_v14 }
 0x200   : > { %703 = shalt.err (!%p700_p3)
}
 0x201   : > { %s704_s20 = scalar_lea.hbm %s933_s16, 1024  ;;  %s708_s26 = scalar_lea.hbm %s985_s3, 2048 }
 0x202   : > { %p705_p4 = scmp.ne.s32.totalorder %s933_s16, %s704_s20  ;;  %p709_p9 = scmp.lt.u32.totalorder %s933_s16, %s985_s3 }
 0x203   : > { %p710_p10 = scmp.lt.u32.totalorder %s708_s26, %s704_s20  ;;  %p712_p12 = scmp.lt.u32.totalorder %s704_s20, %s933_s16 }
 0x204   : > { %p706_p7 = pnand %p705_p4, %p819_p5 }
 0x205   : > { %p711_p11 = por %p710_p10, %p709_p9 }
 0x206   : > { %p707_p8 = pneg %p706_p7 }
 0x207   : > { %p713_p13 = por %p712_p12, %p711_p11 }
 0x209   : > { %p714_p0 = pnand %p713_p13, %p707_p8 }
 0x20b   : > { %717 = shalt.err (!%p714_p0)
}
 0x20c   : > { %s759_s29 = smov 128   ;;  %s760_s30 = smov 8  }
 0x20d   : > { %641 = dma.vmem_to_hbm [thread:$0]  (%p819_p5), %s935_s6, 1024, %s933_s16, %s941_s9, %s759_s29, %s759_s29, %s760_s30  }
 0x20e PF: > { %p647_p1 = scmp.ge.s32.totalorder %s752_s15, 2  ;;  %s486_s4 = sand.u32 1, %s740_s12  }
 0x20f   : > { %s487_s5 = scalar_lea.sflag [#allocation3], %s486_s4 }
 0x210   : > { %p644_p2 = pnand %p647_p1, %p823_p6 }
 0x212   : > { %735 = dma.done.wait (!%p644_p2), %s487_s5, 1024  }
 0x213   : > { %737 = vsyncadd (!%p644_p2), %s487_s5, 4294966272  ;;  %p13_p3 = scmp.ge.s32.totalorder %s806_s18, 4   ;;  %s988_s12 = smov %s744_s13 }
 0x214   : > { %s989_s13 = smov %s748_s14  ;;  %s990_s14 = smov %s817_s21 }
 0x215   : > { %s991_s15 = smov %s806_s18  ;;  %15 = sbr.rel (!%p13_p3) target bundleno = 3 (0x3), region = 67 }
 0x21c   :  { %492 = vsyncpa [#allocation3], 1 }
 0x21d   :  { %494 = vsyncpa [#allocation3 + $0x1], 1 }

</bundles_post_ra>
